<compile_context>
chip_gen: v7x
topology: tpu7x:2x2x1
jax: 0.10.0
libtpu: 0.0.40
codegen_flags: <defaults>
</compile_context>

<pallas_src>
import functools

import jax
import jax.numpy as jnp
from jax.experimental import pallas as pl
from jax.experimental.pallas import tpu as pltpu

LANE = 128          # lane width: last dim of every block is a multiple of this
ROW_ALIGN = 16      # bf16 packs 16 rows per vreg; keep batch tiles 16-aligned
MAX_BATCH_TILE = 512
VMEM_BUDGET_BYTES = 48 << 20   # stay well under v7x's 64 MiB physical VMEM


def _round_up(x: int, m: int) -> int:
    return ((x + m - 1) // m) * m


def _cdiv(a: int, b: int) -> int:
    return -(-a // b)


# --------------------------------------------------------------------------
# Kernel: fused  (z @ W1 + b1) -> relu -> (@ W2 + b2) -> sigmoid   per batch tile
# --------------------------------------------------------------------------
def decoder_kernel(z_ref, w1_ref, b1_ref, w2_ref, b2_ref, out_ref):
    # z_ref:  (TB, Lp)  bf16
    # w1_ref: (Lp, Hp)  bf16    b1_ref: (1, Hp)  f32
    # w2_ref: (Hp, Dp)  bf16    b2_ref: (1, Dp)  f32
    # out_ref:(TB, Dp)  f32
    z = z_ref[...]

    # First linear + ReLU: bf16 MXU operands, f32 accumulation / elementwise.
    h = jnp.dot(z, w1_ref[...], preferred_element_type=jnp.float32) + b1_ref[...]
    h = jnp.maximum(h, 0.0)

    # Second linear: cast h to bf16 only at the dot operand.
    logits = (
        jnp.dot(h.astype(jnp.bfloat16), w2_ref[...],
                preferred_element_type=jnp.float32)
        + b2_ref[...]
    )

    # sigmoid(x) = 1 / (1 + exp(-x)); exp goes to the EUP and the divide is an
    # approx reciprocal (EUP slot) instead of VALU Newton iterations.
    e = jnp.exp(-logits)
    out_ref[...] = pl.reciprocal(1.0 + e, approx=True).astype(out_ref.dtype)


# --------------------------------------------------------------------------
# One-time parameter prep (do this at model-load time, NOT per forward call).
# --------------------------------------------------------------------------
def prepare_decoder_params(w1, b1, w2, b2):
    """Pad feature dims up to lane multiples (128) and cast matmul operands to
    bf16.  Weights are (in_features, out_features); biases (out_features,) or
    (1, out_features).  Returns (prepared_params, dims)."""
    latent_dim, hidden_dim = w1.shape
    input_dim = w2.shape[1]

    Lp = _round_up(latent_dim, LANE)
    Hp = _round_up(hidden_dim, LANE)
    Dp = _round_up(input_dim, LANE)

    # Zero padding is inert: padded latent/hidden columns feed zero weights,
    # padded hidden rows of w2 are zero, padded output columns get sliced off.
    w1p = jnp.pad(w1, ((0, Lp - latent_dim), (0, Hp - hidden_dim))).astype(jnp.bfloat16)
    b1p = jnp.pad(jnp.reshape(b1, (1, -1)), ((0, 0), (0, Hp - hidden_dim))).astype(jnp.float32)
    w2p = jnp.pad(w2, ((0, Hp - hidden_dim), (0, Dp - input_dim))).astype(jnp.bfloat16)
    b2p = jnp.pad(jnp.reshape(b2, (1, -1)), ((0, 0), (0, Dp - input_dim))).astype(jnp.float32)

    dims = dict(latent_dim=latent_dim, hidden_dim=hidden_dim, input_dim=input_dim,
                Lp=Lp, Hp=Hp, Dp=Dp)
    return (w1p, b1p, w2p, b2p), dims


def _choose_batch_tile(B: int) -> int:
    """Balanced, 16-aligned batch tile: pad waste < one tile; >=2 grid steps
    when the batch is large enough so both v7x TensorCores get work."""
    Bp = _round_up(max(B, 1), ROW_ALIGN)
    n_tiles = max(1, _cdiv(Bp, MAX_BATCH_TILE))
    if n_tiles == 1 and Bp >= 128:
        n_tiles = 2  # split so dimension_semantics=("parallel",) shards across TCs
    return _round_up(_cdiv(Bp, n_tiles), ROW_ALIGN)


# --------------------------------------------------------------------------
# Forward wrapper
# --------------------------------------------------------------------------
def decoder_forward(z, prepared_params, dims, *, batch_tile=None,
                    out_dtype=jnp.float32):
    """z: (B, latent_dim) f32 -> (B, input_dim) out_dtype (f32 by default)."""
    w1p, b1p, w2p, b2p = prepared_params
    B, latent_dim = z.shape
    assert latent_dim == dims["latent_dim"]
    Lp, Hp, Dp = dims["Lp"], dims["Hp"], dims["Dp"]
    input_dim = dims["input_dim"]
    out_bytes = jnp.dtype(out_dtype).itemsize

    if batch_tile is None:
        batch_tile = _choose_batch_tile(B)
    batch_tile = _round_up(batch_tile, ROW_ALIGN)

    # VMEM budget: double-buffered z & out tiles + (conservatively) two copies
    # of the grid-invariant params.  Shrink the batch tile if it would blow the
    # budget (matters on v7x's 64 MiB VMEM with large padded input_dim).
    def _tile_bytes(bt):
        return (2 * (bt * Lp * 2 + bt * Dp * out_bytes)
                + 2 * (Lp * Hp * 2 + Hp * Dp * 2 + (Hp + Dp) * 4))

    while batch_tile > ROW_ALIGN and _tile_bytes(batch_tile) > VMEM_BUDGET_BYTES:
        batch_tile = _round_up(batch_tile // 2, ROW_ALIGN)
    # TODO(synk): for very large input_dim (Dp >= ~4096) add a second grid axis
    # over Dp with an h VMEM scratch instead of shrinking the batch tile.

    Bp = _round_up(B, batch_tile)
    grid = (Bp // batch_tile,)

    vmem_limit = int(min(max(_tile_bytes(batch_tile) + (_tile_bytes(batch_tile) // 2)
                             + (4 << 20), 8 << 20), 56 << 20))

    # Only z is touched per call; pad only if needed (the pad is tiny vs out).
    zp = z.astype(jnp.bfloat16)
    if Bp != B or Lp != latent_dim:
        zp = jnp.pad(zp, ((0, Bp - B), (0, Lp - latent_dim)))

    out_padded = pl.pallas_call(
        decoder_kernel,
        out_shape=jax.ShapeDtypeStruct((Bp, Dp), out_dtype),
        grid_spec=pl.GridSpec(
            grid=grid,
            in_specs=[
                # batch tile of z (lane-dense Lp)
                pl.BlockSpec((batch_tile, Lp), lambda i: (i, 0)),
                # grid-invariant weights / biases: constant block index, so
                # Pallas does not re-DMA them per grid step.
                pl.BlockSpec((Lp, Hp), lambda i: (0, 0)),
                pl.BlockSpec((1, Hp), lambda i: (0, 0)),
                pl.BlockSpec((Hp, Dp), lambda i: (0, 0)),
                pl.BlockSpec((1, Dp), lambda i: (0, 0)),
            ],
            out_specs=pl.BlockSpec((batch_tile, Dp), lambda i: (i, 0)),
        ),
        compiler_params=pltpu.CompilerParams(
            dimension_semantics=("parallel",),
            vmem_limit_bytes=vmem_limit,
        ),
    )(zp, w1p, b1p, w2p, b2p)

    # Slice only when padding actually exists (the slice is an extra HBM pass).
    if Bp == B and Dp == input_dim:
        return out_padded
    return out_padded[:B, :input_dim]


# --------------------------------------------------------------------------
# Param init mirroring nn.Linear defaults (U[-1/sqrt(fan_in), 1/sqrt(fan_in)]).
# Weights stored pre-transposed as (in_features, out_features).
# --------------------------------------------------------------------------
def init_decoder_params(key, input_dim, hidden_dim, latent_dim):
    k1, k2, k3, k4 = jax.random.split(key, 4)
    bound1 = 1.0 / jnp.sqrt(latent_dim)
    bound2 = 1.0 / jnp.sqrt(hidden_dim)
    w1 = jax.random.uniform(k1, (latent_dim, hidden_dim), jnp.float32, -bound1, bound1)
    b1 = jax.random.uniform(k2, (1, hidden_dim), jnp.float32, -bound1, bound1)
    w2 = jax.random.uniform(k3, (hidden_dim, input_dim), jnp.float32, -bound2, bound2)
    b2 = jax.random.uniform(k4, (1, input_dim), jnp.float32, -bound2, bound2)
    return w1, b1, w2, b2


if __name__ == "__main__":
    # Small shapes consistent with the module's forward.
    B, input_dim, hidden_dim, latent_dim = 16, 64, 32, 8

    key = jax.random.PRNGKey(0)
    k_z, k_p = jax.random.split(key)
    z = jax.random.normal(k_z, (B, latent_dim), jnp.float32)
    w1, b1, w2, b2 = init_decoder_params(k_p, input_dim, hidden_dim, latent_dim)

    # One-time prep (padding + bf16 cast) — outside the per-call path.
    prepared, dims = prepare_decoder_params(w1, b1, w2, b2)
    prepared = jax.block_until_ready(prepared)

    fwd = jax.jit(functools.partial(decoder_forward, dims=dims))
    out = jax.block_until_ready(fwd(z, prepared))

    # Pure-JAX f32 reference; kernel uses bf16 MXU operands + approx reciprocal
    # so compare with a tolerance that comfortably covers that rounding.
    h_ref = jnp.maximum(z @ w1 + b1, 0.0)
    ref = jax.nn.sigmoid(h_ref @ w2 + b2)
    assert out.shape == (B, input_dim)
    assert jnp.allclose(out, ref, atol=2e-2, rtol=2e-2), (
        float(jnp.max(jnp.abs(out - ref)))
    )

    print("KERNEL_OK")
</pallas_src>

<mosaic_0001>
module attributes {stable_mosaic.version = 11 : i64} {
  func.func @decoder_kernel(%arg0: i32, %arg1: memref<16x128xbf16, #tpu.memory_space<vmem>>, %arg2: memref<128x128xbf16, #tpu.memory_space<vmem>>, %arg3: memref<1x128xf32, #tpu.memory_space<vmem>>, %arg4: memref<128x128xbf16, #tpu.memory_space<vmem>>, %arg5: memref<1x128xf32, #tpu.memory_space<vmem>>, %arg6: memref<16x128xf32, #tpu.memory_space<vmem>>) attributes {dimension_semantics = [#tpu.dimension_semantics<parallel>], iteration_bounds = array<i64: 1>, scalar_prefetch = 0 : i64, scratch_operands = 0 : i64, tpu.core_type = #tpu.core_type<tc>, window_params = [{transform_indices = @transform_0, window_bounds = array<i64: 16, 128>}, {pipeline_mode = #tpu.pipeline_mode<synchronous>, transform_indices = @transform_1, window_bounds = array<i64: 128, 128>}, {pipeline_mode = #tpu.pipeline_mode<synchronous>, transform_indices = @transform_2, window_bounds = array<i64: 1, 128>}, {pipeline_mode = #tpu.pipeline_mode<synchronous>, transform_indices = @transform_3, window_bounds = array<i64: 128, 128>}, {pipeline_mode = #tpu.pipeline_mode<synchronous>, transform_indices = @transform_4, window_bounds = array<i64: 1, 128>}, {transform_indices = @transform_5, window_bounds = array<i64: 16, 128>}]} {
    %c0 = arith.constant 0 : index
    %c0_0 = arith.constant 0 : index
    %0 = vector.load %arg1[%c0, %c0_0] : memref<16x128xbf16, #tpu.memory_space<vmem>>, vector<16x128xbf16>
    %c0_1 = arith.constant 0 : index
    %c0_2 = arith.constant 0 : index
    %1 = vector.load %arg2[%c0_1, %c0_2] : memref<128x128xbf16, #tpu.memory_space<vmem>>, vector<128x128xbf16>
    %cst = arith.constant dense<0.000000e+00> : vector<16x128xf32>
    %2 = tpu.matmul %0, %1, %cst {dimension_numbers = #tpu.dot_dimension_numbers<[1], [0], [0], [1], [0, 0, 1, 1], [], []>} : vector<16x128xbf16>, vector<128x128xbf16>, vector<16x128xf32> -> vector<16x128xf32>
    %c0_3 = arith.constant 0 : index
    %c0_4 = arith.constant 0 : index
    %3 = vector.load %arg3[%c0_3, %c0_4] : memref<1x128xf32, #tpu.memory_space<vmem>>, vector<1x128xf32>
    %4 = vector.broadcast %3 : vector<1x128xf32> to vector<16x128xf32>
    %5 = arith.addf %2, %4 : vector<16x128xf32>
    %cst_5 = arith.constant 0.000000e+00 : f32
    %6 = vector.broadcast %cst_5 : f32 to vector<16x128xf32>
    %7 = arith.maximumf %5, %6 : vector<16x128xf32>
    %8 = arith.truncf %7 : vector<16x128xf32> to vector<16x128xbf16>
    %c0_6 = arith.constant 0 : index
    %c0_7 = arith.constant 0 : index
    %9 = vector.load %arg4[%c0_6, %c0_7] : memref<128x128xbf16, #tpu.memory_space<vmem>>, vector<128x128xbf16>
    %cst_8 = arith.constant dense<0.000000e+00> : vector<16x128xf32>
    %10 = tpu.matmul %8, %9, %cst_8 {dimension_numbers = #tpu.dot_dimension_numbers<[1], [0], [0], [1], [0, 0, 1, 1], [], []>} : vector<16x128xbf16>, vector<128x128xbf16>, vector<16x128xf32> -> vector<16x128xf32>
    %c0_9 = arith.constant 0 : index
    %c0_10 = arith.constant 0 : index
    %11 = vector.load %arg5[%c0_9, %c0_10] : memref<1x128xf32, #tpu.memory_space<vmem>>, vector<1x128xf32>
    %12 = vector.broadcast %11 : vector<1x128xf32> to vector<16x128xf32>
    %13 = arith.addf %10, %12 : vector<16x128xf32>
    %cst_11 = arith.constant 0.000000e+00 : f32
    %14 = vector.broadcast %cst_11 : f32 to vector<16x128xf32>
    %15 = arith.subf %14, %13 : vector<16x128xf32>
    %16 = math.exp %15 : vector<16x128xf32>
    %cst_12 = arith.constant 1.000000e+00 : f32
    %17 = vector.broadcast %cst_12 : f32 to vector<16x128xf32>
    %18 = arith.addf %17, %16 : vector<16x128xf32>
    %19 = tpu.reciprocal %18 {approx = true} : vector<16x128xf32> -> vector<16x128xf32>
    %c0_13 = arith.constant 0 : index
    %c0_14 = arith.constant 0 : index
    %20 = vector.load %arg6[%c0_13, %c0_14] : memref<16x128xf32, #tpu.memory_space<vmem>>, vector<16x128xf32>
    tpu.vector_store %arg6[%c0_13, %c0_14], %19 {strides = array<i32>} : memref<16x128xf32, #tpu.memory_space<vmem>>, vector<16x128xf32>,
    return
  }
  func.func @transform_0(%arg0: i32) -> (i32, i32) {
    %c0_i32 = arith.constant 0 : i32
    %c0_i32_0 = arith.constant 0 : i32
    return %arg0, %c0_i32 : i32, i32
  }
  func.func @transform_1(%arg0: i32) -> (i32, i32) {
    %c0_i32 = arith.constant 0 : i32
    %c0_i32_0 = arith.constant 0 : i32
    %c0_i32_1 = arith.constant 0 : i32
    return %c0_i32, %c0_i32_0 : i32, i32
  }
  func.func @transform_2(%arg0: i32) -> (i32, i32) {
    %c0_i32 = arith.constant 0 : i32
    %c0_i32_0 = arith.constant 0 : i32
    %c0_i32_1 = arith.constant 0 : i32
    return %c0_i32, %c0_i32_0 : i32, i32
  }
  func.func @transform_3(%arg0: i32) -> (i32, i32) {
    %c0_i32 = arith.constant 0 : i32
    %c0_i32_0 = arith.constant 0 : i32
    %c0_i32_1 = arith.constant 0 : i32
    return %c0_i32, %c0_i32_0 : i32, i32
  }
  func.func @transform_4(%arg0: i32) -> (i32, i32) {
    %c0_i32 = arith.constant 0 : i32
    %c0_i32_0 = arith.constant 0 : i32
    %c0_i32_1 = arith.constant 0 : i32
    return %c0_i32, %c0_i32_0 : i32, i32
  }
  func.func @transform_5(%arg0: i32) -> (i32, i32) {
    %c0_i32 = arith.constant 0 : i32
    %c0_i32_0 = arith.constant 0 : i32
    return %arg0, %c0_i32 : i32, i32
  }
}

</mosaic_0001>

<bundles_post_ra>
// kernel: decoder_forward.1
= control target key start
LH: loop header
LB: loop body
LE: loop exit
PB: predicated region body
PF: predicated region fallthrough
CT: control target
= control target key end

     0   :  { %10 = vsyncpa [#allocation3], 0  ;;  %s582_s0 = inlined_call_operand.vmem [shape: bf16[16,128], index: 0, kind: input, shape index: {}]   ;;  %s583_s1 = inlined_call_operand.hbm [shape: bf16[128,128], index: 1, kind: input, shape index: {}]   ;;  %s584_s2 = inlined_call_operand.vmem [shape: f32[1,128], index: 2, kind: input, shape index: {}]   ;;  %s585_s3 = inlined_call_operand.hbm [shape: bf16[128,128], index: 3, kind: input, shape index: {}]   ;;  %s586_s4 = inlined_call_operand.vmem [shape: f32[1,128], index: 4, kind: input, shape index: {}]   ;;  %s587_s5 = inlined_call_operand.hbm [shape: f32[16,128], index: 5, kind: output, shape index: {}]  }
   0x1   :  { %11 = vsyncpa [#allocation6], 0 }
   0x2   :  { %12 = vsyncpa [#allocation4], 0  ;;  %s498_s18 = smov [#allocation2]   ;;  %s426_s22 = scalar_lea.hbm %s583_s1, 1024 }
   0x3   :  { %s20_s19 = sshll.u32 %s498_s18, 4  ;;  %p427_p0 = scmp.ne.s32.totalorder %s583_s1, %s426_s22  ;;  %s21_s19 = int_to_ptr.vmem [resolvable:$true] %s20_s19 }
   0x4   :  { %p430_p1 = scmp.lt.u32.totalorder %s426_s22, %s583_s1 }
   0x6   :  { %p432_p2 = pnand %p430_p1, %p427_p0 }
   0x8   :  { %435 = shalt.err (!%p432_p2)
}
   0x9   :  { %s436_s27 = scalar_lea.vmem %s21_s19, 1024  ;;  %p441_p4 = scmp.lt.s32.totalorder %s21_s19, %s21_s19 }
   0xa   :  { %p437_p3 = scmp.ne.s32.totalorder %s21_s19, %s436_s27  ;;  %p442_p5 = scmp.lt.s32.totalorder %s436_s27, %s436_s27 }
   0xc   :  { %p443_p6 = por %p442_p5, %p441_p4 }
   0xe   :  { %p444_p7 = pnand %p443_p6, %p437_p3 }
  0x10   :  { %447 = shalt.err (!%p444_p7)
}
  0x11   :  { %s499_s28 = smov 64   ;;  %s500_s29 = smov 4  }
  0x12   :  { %26 = dma.hbm_to_vmem [thread:$0]  %s583_s1, 1024, %s21_s19, [#allocation3], %s499_s28, %s499_s28, %s500_s29  }
  0x13   :  { %s501_s7 = smov [#allocation5]   ;;  %s448_s11 = scalar_lea.hbm %s585_s3, 1024 }
  0x14   :  { %s34_s8 = sshll.u32 %s501_s7, 4  ;;  %p449_p8 = scmp.ne.s32.totalorder %s585_s3, %s448_s11  ;;  %s35_s8 = int_to_ptr.vmem [resolvable:$true] %s34_s8 }
  0x15   :  { %p452_p9 = scmp.lt.u32.totalorder %s448_s11, %s585_s3 }
  0x17   :  { %p454_p10 = pnand %p452_p9, %p449_p8 }
  0x19   :  { %457 = shalt.err (!%p454_p10)
}
  0x1a   :  { %s458_s16 = scalar_lea.vmem %s35_s8, 1024  ;;  %p463_p12 = scmp.lt.s32.totalorder %s35_s8, %s35_s8 }
  0x1b   :  { %p459_p11 = scmp.ne.s32.totalorder %s35_s8, %s458_s16  ;;  %p464_p13 = scmp.lt.s32.totalorder %s458_s16, %s458_s16 }
  0x1d   :  { %p465_p0 = por %p464_p13, %p463_p12 }
  0x1f   :  { %p466_p1 = pnand %p465_p0, %p459_p11 }
  0x21   :  { %469 = shalt.err (!%p466_p1)
}
  0x22   :  { %40 = dma.hbm_to_vmem [thread:$0]  %s585_s3, 1024, %s35_s8, [#allocation6], %s499_s28, %s499_s28, %s500_s29  }
  0x23   :  { %492 = dma.done.wait [#allocation3], 1024  }
  0x24   :  { %493 = vsyncadd [#allocation3], 4294966272 }
  0x25   :  { %494 = dma.done.wait [#allocation6], 1024  }
  0x26   :  { %495 = vsyncadd [#allocation6], 4294966272  ;;  %v502_v0 = vmov 0.0   ;;  %vm503_vm0 = vmmov 0   ;;  %v401_v1 = vld [vmem:[#allocation2] sm:$0xff]   ;;  %v402_v2 = vld [vmem:[#allocation2 + $0x8] sm:$0xff]  }
  0x27   :  { %352 = vmatprep.subr.bf16.mxu0 %v502_v0  ;;  %368 = vmatprep.mubr.msk.bf16.mxu0 %vm503_vm0, %v502_v0  ;;  %v403_v3 = vld [vmem:[#allocation2 + $0x10] sm:$0xff]   ;;  %v410_v4 = vld [vmem:[#allocation5] sm:$0xff]   ;;  %v404_v5 = vld [vmem:[#allocation2 + $0x18] sm:$0xff]  }
  0x28   :  { %372 = vmatprep.subr.bf16.mxu1 %v502_v0  ;;  %388 = vmatprep.mubr.msk.bf16.mxu1 %vm503_vm0, %v502_v0  ;;  %v411_v6 = vld [vmem:[#allocation5 + $0x8] sm:$0xff]   ;;  %v405_v7 = vld [vmem:[#allocation2 + $0x20] sm:$0xff]   ;;  %v412_v8 = vld [vmem:[#allocation5 + $0x10] sm:$0xff]  }
  0x29   :  { %353 = vmatpush3.bf16.msra.mxu0 %v401_v1  ;;  %373 = vmatpush3.bf16.msra.mxu1 %v410_v4  ;;  %v406_v9 = vld [vmem:[#allocation2 + $0x28] sm:$0xff]   ;;  %v413_v10 = vld [vmem:[#allocation5 + $0x18] sm:$0xff]   ;;  %v407_v11 = vld [vmem:[#allocation2 + $0x30] sm:$0xff]  }
  0x2a   :  { %354 = vmatprep.subr.bf16.mxu0 %v502_v0  ;;  %374 = vmatprep.subr.bf16.mxu1 %v502_v0  ;;  %v414_v12 = vld [vmem:[#allocation5 + $0x20] sm:$0xff]   ;;  %v408_v13 = vld [vmem:[#allocation2 + $0x38] sm:$0xff]   ;;  %v415_v14 = vld [vmem:[#allocation5 + $0x28] sm:$0xff]  }
  0x2b   :  { %v409_v15 = vld [vmem:[%s582_s0] sm:$0xff]   ;;  %v416_v16 = vld [vmem:[#allocation5 + $0x30] sm:$0xff]   ;;  %v417_v17 = vld [vmem:[#allocation5 + $0x38] sm:$0xff]  }
  0x2c   :  { %v315_v18 = vld [vmem:[%s584_s2] ss:$0 sm:$0xff]  ;;  %s504_s2 = smov [#allocation7]  }
  0x2d   :  { %355 = vmatpush3.bf16.msra.mxu0 %v402_v2  ;;  %375 = vmatpush3.bf16.msra.mxu1 %v411_v6  ;;  %v325_v28 = vld [vmem:[%s586_s4] ss:$0 sm:$0xff]  ;;  %s302_s4 = sshll.u32 %s504_s2, 4  ;;  %s303_s4 = int_to_ptr.vmem [resolvable:$true] %s302_s4 }
  0x2e   :  { %356 = vmatprep.subr.bf16.mxu0 %v502_v0  ;;  %376 = vmatprep.subr.bf16.mxu1 %v502_v0  ;;  %s470_s22 = scalar_lea.vmem %s303_s4, 256  ;;  %p475_p3 = scmp.lt.s32.totalorder %s303_s4, %s303_s4 }
  0x2f   :  { %p471_p2 = scmp.ne.s32.totalorder %s303_s4, %s470_s22  ;;  %p476_p4 = scmp.lt.s32.totalorder %s470_s22, %s470_s22 }
  0x31   :  { %357 = vmatpush3.bf16.msra.mxu0 %v403_v3  ;;  %377 = vmatpush3.bf16.msra.mxu1 %v412_v8  ;;  %p477_p5 = por %p476_p4, %p475_p3 }
  0x32   :  { %358 = vmatprep.subr.bf16.mxu0 %v502_v0  ;;  %378 = vmatprep.subr.bf16.mxu1 %v502_v0 }
  0x33   :  { %p478_p6 = pnand %p477_p5, %p471_p2 }
  0x35   :  { %359 = vmatpush3.bf16.msra.mxu0 %v404_v5  ;;  %379 = vmatpush3.bf16.msra.mxu1 %v413_v10 }
  0x36   :  { %360 = vmatprep.subr.bf16.mxu0 %v502_v0  ;;  %380 = vmatprep.subr.bf16.mxu1 %v502_v0 }
  0x39   :  { %361 = vmatpush3.bf16.msra.mxu0 %v405_v7  ;;  %381 = vmatpush3.bf16.msra.mxu1 %v414_v12 }
  0x3a   :  { %362 = vmatprep.subr.bf16.mxu0 %v502_v0  ;;  %382 = vmatprep.subr.bf16.mxu1 %v502_v0 }
  0x3d   :  { %363 = vmatpush3.bf16.msra.mxu0 %v406_v9  ;;  %383 = vmatpush3.bf16.msra.mxu1 %v415_v14 }
  0x3e   :  { %364 = vmatprep.subr.bf16.mxu0 %v502_v0  ;;  %384 = vmatprep.subr.bf16.mxu1 %v502_v0 }
  0x41   :  { %365 = vmatpush3.bf16.msra.mxu0 %v407_v11  ;;  %385 = vmatpush3.bf16.msra.mxu1 %v416_v16 }
  0x42   :  { %366 = vmatprep.subr.bf16.mxu0 %v502_v0  ;;  %386 = vmatprep.subr.bf16.mxu1 %v502_v0 }
  0x45   :  { %367 = vmatpush3.bf16.msra.mxu0 %v408_v13  ;;  %387 = vmatpush3.bf16.msra.mxu1 %v417_v17 }
  0x48   :  { %369 = vmatmul.mubr.bf16.vlgmr.msra.gmra.mrb[0].mxu0 %v409_v15 }
 0x11b   :  { %v163_v19 = vpop.f32.mrb[0].mxu0 }
 0x11c   :  { %v164_v20 = vadd.f32 %v315_v18, %v163_v19  ;;  %v370_v21 = vpop.f32.mrb[1].mxu0 }
 0x11d   :  { %v166_v22 = vpop.f32.mrb[2].mxu0 }
 0x11e   :  { %v167_v23 = vadd.f32 %v315_v18, %v166_v22  ;;  %v371_v24 = vpop.f32.mrb[3].mxu0  ;;  %v170_v25 = vmax.f32 %v164_v20, 0.0 }
 0x120   :  { %v171_v26 = vmax.f32 %v167_v23, 0.0 }
 0x122   :  { %v172_v27 = vpack.c.bf16 %v171_v26, %v170_v25 }
 0x124   :  { %389 = vmatmul.mubr.bf16.vlgmr.msra.gmra.mrb[0].mxu1 %v172_v27 }
 0x1f7   :  { %v278_v29 = vpop.f32.mrb[0].mxu1 }
 0x1f8   :  { %v279_v30 = vadd.f32 %v325_v28, %v278_v29  ;;  %v390_v31 = vpop.f32.mrb[1].mxu1 }
 0x1f9   :  { %v281_v32 = vpop.f32.mrb[2].mxu1 }
 0x1fa   :  { %v285_v33 = vsub.f32 0.0, %v279_v30  ;;  %v282_v34 = vadd.f32 %v325_v28, %v281_v32  ;;  %v391_v35 = vpop.f32.mrb[3].mxu1 }
 0x1fc   :  { %v287_v36 = vmul.f32 1.442695, %v285_v33  ;;  %v286_v37 = vsub.f32 0.0, %v282_v34 }
 0x1fe   :  { %418 = vpow2.f32 %v287_v36  ;;  %v289_v38 = vmul.f32 1.442695, %v286_v37 }
 0x200   :  { %420 = vpow2.f32 %v289_v38 }
 0x208   :  { %v419_v39 = vpop.eup %418 }
 0x209   :  { %v291_v40 = vadd.f32 1.0, %v419_v39 }
 0x20a   :  { %v421_v41 = vpop.eup %420 }
 0x20b   :  { %422 = vrcp.f32 %v291_v40  ;;  %v292_v42 = vadd.f32 1.0, %v421_v41 }
 0x20d   :  { %424 = vrcp.f32 %v292_v42 }
 0x215   :  { %v423_v43 = vpop.eup %422 }
 0x216   :  { %295 = vst [vmem:[#allocation7] sm:$0xff] %v423_v43 }
 0x217   :  { %v425_v44 = vpop.eup %424 }
 0x218   :  { %296 = vst [vmem:[#allocation7 + $0x8] sm:$0xff] %v425_v44 }
 0x219   :  { %481 = shalt.err (!%p478_p6)
}
 0x21a   :  { %s482_s25 = scalar_lea.hbm %s587_s5, 256 }
 0x21b   :  { %p483_p7 = scmp.ne.s32.totalorder %s587_s5, %s482_s25  ;;  %p486_p8 = scmp.lt.u32.totalorder %s482_s25, %s587_s5 }
 0x21d   :  { %p488_p9 = pnand %p486_p8, %p483_p7 }
 0x21f   :  { %491 = shalt.err (!%p488_p9)
}
 0x220   :  { %s505_s30 = smov 128   ;;  %s506_s6 = smov 8  }
 0x221   :  { %308 = dma.vmem_to_hbm [thread:$0]  %s303_s4, 256, %s587_s5, [#allocation4], %s505_s30, %s505_s30, %s506_s6  }
 0x222   :  { %496 = dma.done.wait [#allocation4], 256  }
 0x223   :  { %497 = vsyncadd [#allocation4], 4294967040 }
 0x224   :  { %312 = vsyncpa [#allocation3], 1 }
 0x225   :  { %313 = vsyncpa [#allocation6], 1 }
 0x226   :  { %314 = vsyncpa [#allocation4], 1 }

</bundles_post_ra>
